<compile_context>
chip_gen: v6e
topology: v6e:2x2x1
jax: 0.10.0
libtpu: 0.0.40
codegen_flags: <defaults>
</compile_context>

<pallas_src>
import jax
import jax.numpy as jnp
from jax.experimental import pallas as pl
from jax.experimental.pallas import tpu as pltpu


TR_TARGET = 8192                 # rows of 128 lanes per grid step (f32: 4 MiB/tensor)
SMALL_INPUT_BYTES = 1 << 20      # below this, plain XLA beats pallas dispatch cost


def _gtconv_kernel(w_ref, a_ref, o_ref):
    # w_ref: SMEM (2,) float32 -- softmax(weight) (scalar prefetch)
    # a_ref: VMEM (2, tr, 128) -- current row tile of both stacked tensors
    # o_ref: VMEM (tr, 128)
    acc = a_ref[0] * w_ref[0] + a_ref[1] * w_ref[1]
    o_ref[...] = acc.astype(o_ref.dtype)


def gtconv(A, weight, *, force_pallas=False):
    """GTConv forward: sum(A * softmax(weight, axis=1), axis=0).

    A: (2, ...) stack of 2 tensors; weight: (2, 1, 1, 1) float32.
    """
    K = A.shape[0]
    assert K == 2, "GTConv expects a stack of 2 tensors along dim 0"
    out_shape = A.shape[1:]
    n = 1
    for d in out_shape:
        n *= d
    itemsize = jnp.dtype(A.dtype).itemsize

    # softmax over dim=1 (size 1) -- identically 1.0, kept for exact semantics.
    w = jax.nn.softmax(weight.astype(jnp.float32), axis=1).reshape(K)

    # Fast path: tiny inputs.
    if not force_pallas and n * itemsize < SMALL_INPUT_BYTES:
        w_b = w.reshape((K,) + (1,) * len(out_shape))
        return jnp.sum(A * w_b, axis=0).astype(A.dtype)

    # Lane-dense flatten: (2, r, 128). Pad only if n is not a 128 multiple.
    r = pl.cdiv(n, 128)
    n_lanes = r * 128
    a_flat = A.reshape(K, n)
    padded = n_lanes != n
    if padded:
        a_flat = jnp.pad(a_flat, ((0, 0), (0, n_lanes - n)))
    a3 = a_flat.reshape(K, r, 128)

    # Row tile: if the whole problem fits one step, the block equals the full
    # array extent (no alignment requirement); otherwise TR_TARGET (a multiple
    # of 32, so sublane packing is satisfied for f32/bf16/int8 alike).  The
    # ragged last block of the grid is masked by Pallas -- no HBM pad copy.
    tr = r if r <= TR_TARGET else TR_TARGET
    grid = (pl.cdiv(r, tr),)

    out = pl.pallas_call(
        _gtconv_kernel,
        out_shape=jax.ShapeDtypeStruct((r, 128), A.dtype),
        grid_spec=pltpu.PrefetchScalarGridSpec(
            num_scalar_prefetch=1,  # w -> SMEM, passed first to kernel & index_maps
            grid=grid,
            in_specs=[
                pl.BlockSpec((K, tr, 128), lambda i, w_ref: (0, i, 0)),
            ],
            out_specs=pl.BlockSpec((tr, 128), lambda i, w_ref: (i, 0)),
        ),
        compiler_params=pltpu.CompilerParams(
            dimension_semantics=("parallel",),
            # double-buffered footprint: 2 * (2 + 1) * tr * 128 * itemsize
            # (~24 MiB at TR=8192/f32) -- within v7x's 64 MiB physical VMEM.
            vmem_limit_bytes=48 * 1024 * 1024,
        ),
        cost_estimate=pl.CostEstimate(
            flops=3 * n_lanes,                      # 2 muls + 1 add per element
            transcendentals=0,
            bytes_accessed=3 * n_lanes * itemsize,  # read 2x, write 1x
        ),
    )(w, a3)

    if padded:
        return out.reshape(n_lanes)[:n].reshape(out_shape)
    return out.reshape(out_shape)


if __name__ == "__main__":
    key = jax.random.PRNGKey(0)
    k_w, k_a = jax.random.split(key)

    # Parameter init: nn.init.normal_(self.weight) on shape (2, 1, 1, 1)
    weight = jax.random.normal(k_w, (2, 1, 1, 1), dtype=jnp.float32)

    def ref_fn(A, weight):
        return jnp.sum(A * jax.nn.softmax(weight, axis=1), axis=0)

    # 1) Module-spec shape (tiny -> plain-XLA fast path), semantics check.
    A_small = jax.random.normal(k_a, (2, 4, 16, 16), dtype=jnp.float32)
    out_fast = jax.block_until_ready(gtconv(A_small, weight))
    assert out_fast.shape == (4, 16, 16)
    assert jnp.allclose(out_fast, ref_fn(A_small, weight), atol=1e-5, rtol=1e-5)

    # 2) Same tiny input forced through the Pallas kernel (single full-extent
    #    block, grid=(1,)) so the kernel path is exercised.
    out_p_small = jax.block_until_ready(gtconv(A_small, weight, force_pallas=True))
    assert jnp.allclose(out_p_small, ref_fn(A_small, weight), atol=1e-5, rtol=1e-5)

    # 3) Unaligned shape (n % 128 != 0) forced through Pallas -> exercises the
    #    lane-padding + tail-slice path.
    A_unal = jax.random.normal(jax.random.PRNGKey(1), (2, 3, 77, 129), dtype=jnp.float32)
    out_unal = jax.block_until_ready(gtconv(A_unal, weight, force_pallas=True))
    assert jnp.allclose(out_unal, ref_fn(A_unal, weight), atol=1e-5, rtol=1e-5)

    # 4) Larger input that naturally takes the Pallas path with a multi-step
    #    grid and a ragged last block (r=8320 rows, tr=8192, grid=(2,)).
    A_big = jax.random.normal(jax.random.PRNGKey(2), (2, 4, 512, 520), dtype=jnp.float32)
    out_big = jax.block_until_ready(gtconv(A_big, weight))
    assert out_big.shape == (4, 512, 520)
    assert jnp.allclose(out_big, ref_fn(A_big, weight), atol=1e-5, rtol=1e-5)

    print("KERNEL_OK")
</pallas_src>

<mosaic_0001>
module attributes {stable_mosaic.version = 11 : i64} {
  func.func @_gtconv_kernel(%arg0: i32, %arg1: memref<2xf32, #tpu.memory_space<smem>>, %arg2: memref<2x8x128xf32, #tpu.memory_space<vmem>>, %arg3: memref<8x128xf32, #tpu.memory_space<vmem>>) attributes {dimension_semantics = [#tpu.dimension_semantics<parallel>], iteration_bounds = array<i64: 1>, scalar_prefetch = 1 : i64, scratch_operands = 0 : i64, tpu.core_type = #tpu.core_type<tc>, window_params = [{transform_indices = @transform_0, window_bounds = array<i64: 2, 8, 128>}, {transform_indices = @transform_1, window_bounds = array<i64: 8, 128>}]} {
    %c0 = arith.constant 0 : index
    %c0_0 = arith.constant 0 : index
    %c0_1 = arith.constant 0 : index
    %0 = vector.load %arg2[%c0, %c0_0, %c0_1] : memref<2x8x128xf32, #tpu.memory_space<vmem>>, vector<1x8x128xf32>
    %1 = vector.shape_cast %0 : vector<1x8x128xf32> to vector<8x128xf32>
    %c0_2 = arith.constant 0 : index
    %2 = memref.load %arg1[%c0_2] : memref<2xf32, #tpu.memory_space<smem>>
    %3 = vector.broadcast %2 : f32 to vector<8x128xf32>
    %4 = arith.mulf %1, %3 : vector<8x128xf32>
    %c1 = arith.constant 1 : index
    %c0_3 = arith.constant 0 : index
    %c0_4 = arith.constant 0 : index
    %5 = vector.load %arg2[%c1, %c0_3, %c0_4] : memref<2x8x128xf32, #tpu.memory_space<vmem>>, vector<1x8x128xf32>
    %6 = vector.shape_cast %5 : vector<1x8x128xf32> to vector<8x128xf32>
    %c1_5 = arith.constant 1 : index
    %7 = memref.load %arg1[%c1_5] : memref<2xf32, #tpu.memory_space<smem>>
    %8 = vector.broadcast %7 : f32 to vector<8x128xf32>
    %9 = arith.mulf %6, %8 : vector<8x128xf32>
    %10 = arith.addf %4, %9 : vector<8x128xf32>
    %c0_6 = arith.constant 0 : index
    %c0_7 = arith.constant 0 : index
    %11 = vector.load %arg3[%c0_6, %c0_7] : memref<8x128xf32, #tpu.memory_space<vmem>>, vector<8x128xf32>
    tpu.vector_store %arg3[%c0_6, %c0_7], %10 {strides = array<i32>} : memref<8x128xf32, #tpu.memory_space<vmem>>, vector<8x128xf32>,
    return
  }
  func.func @transform_0(%arg0: i32, %arg1: memref<2xf32, #tpu.memory_space<smem>>) -> (i32, i32, i32) {
    %c0_i32 = arith.constant 0 : i32
    %c0_i32_0 = arith.constant 0 : i32
    %c0_i32_1 = arith.constant 0 : i32
    return %c0_i32, %arg0, %c0_i32_0 : i32, i32, i32
  }
  func.func @transform_1(%arg0: i32, %arg1: memref<2xf32, #tpu.memory_space<smem>>) -> (i32, i32) {
    %c0_i32 = arith.constant 0 : i32
    %c0_i32_0 = arith.constant 0 : i32
    return %arg0, %c0_i32 : i32, i32
  }
}

</mosaic_0001>

<bundles_post_ra>
// kernel: tpu_custom_call.1
= control target key start
LH: loop header
LB: loop body
LE: loop exit
PB: predicated region body
PF: predicated region fallthrough
CT: control target
= control target key end

     0   :  { %s114_s9 = smov [#allocation3]   ;;  %s143_s0 = inlined_call_operand.hbm [shape: f32[2], index: 0, kind: input, shape index: {}]   ;;  %s144_s1 = inlined_call_operand.hbm [shape: f32[2,8,128], index: 1, kind: input, shape index: {}]   ;;  %s145_s2 = inlined_call_operand.hbm [shape: f32[8,128], index: 2, kind: output, shape index: {}]  }
   0x1   :  { %8 = dma.hbm_to_smem %s143_s0, 16, %s114_s9, [#allocation2] }
   0x2   :  { %108 = dma.done.wait [#allocation2], 16 }
   0x3   :  { %109 = vsyncadd [#allocation2], 4294967280 }
   0x4   :  { %10 = sfence }
   0x5   :  { %11 = vsyncpa [#allocation5], 0 }
   0x6   :  { %12 = vsyncpa [#allocation6], 0  ;;  %s115_s12 = smov [#allocation4]  }
   0x7   :  { %s18_s13 = sshll.u32 %s115_s12, 4  ;;  %s19_s13 = int_to_ptr.vmem [resolvable:$true] %s18_s13 }
   0x8   :  { %s76_s14 = scalar_lea.vmem %s19_s13, 256  ;;  %p81_p1 = scmp.lt.s32.totalorder %s19_s13, %s19_s13 }
   0x9   :  { %p77_p0 = scmp.ne.s32.totalorder %s19_s13, %s76_s14  ;;  %p82_p2 = scmp.lt.s32.totalorder %s76_s14, %s76_s14 }
   0xb   :  { %p83_p3 = por %p82_p2, %p81_p1 }
   0xd   :  { %p84_p4 = pnand %p83_p3, %p77_p0 }
   0xf   :  { %87 = shalt.err (!%p84_p4)
}
  0x10   :  { %s116_s15 = smov 128   ;;  %s117_s16 = smov 8  }
  0x11   :  { %24 = dma.hbm_to_vmem [thread:$0]  %s144_s1, 256, %s19_s13, [#allocation5], %s116_s15, %s116_s15, %s117_s16  }
  0x12   :  { %110 = dma.done.wait [#allocation5], 256  }
  0x13   :  { %111 = vsyncadd [#allocation5], 4294967040  ;;  %s29_s0 = sld [smem:[#allocation3]]  ;;  %v28_v0 = vld [vmem:[#allocation4] sm:$0xff]  ;;  %v33_v2 = vld [vmem:[#allocation4 + $0x8] sm:$0xff]  ;;  %s118_s20 = smov [#allocation7]  }
  0x14   :  { %s54_s19 = sld [smem:[#allocation3 + $0x1]]  ;;  %s45_s21 = sshll.u32 %s118_s20, 4  ;;  %s46_s21 = int_to_ptr.vmem [resolvable:$true] %s45_s21 }
  0x15   :  { %s88_s22 = scalar_lea.vmem %s46_s21, 128  ;;  %p93_p6 = scmp.lt.s32.totalorder %s46_s21, %s46_s21 }
  0x16   :  { %p89_p5 = scmp.ne.s32.totalorder %s46_s21, %s88_s22  ;;  %p94_p7 = scmp.lt.s32.totalorder %s88_s22, %s88_s22 }
  0x18   :  { %p95_p8 = por %p94_p7, %p93_p6 }
  0x19   :  { %v30_v1 = vstv %s29_s0 }
  0x1a   :  { %v31_v3 = vmul.f32 %v30_v1, %v28_v0  ;;  %v35_v4 = vstv %s54_s19  ;;  %p96_p9 = pnand %p95_p8, %p89_p5 }
  0x1b   :  { %v36_v5 = vmul.f32 %v35_v4, %v33_v2 }
  0x1d   :  { %v37_v6 = vadd.f32 %v36_v5, %v31_v3 }
  0x1f   :  { %38 = vst [vmem:[#allocation7] sm:$0xff] %v37_v6 }
  0x20   :  { %99 = shalt.err (!%p96_p9)
}
  0x21   :  { %48 = dma.vmem_to_hbm [thread:$0]  %s46_s21, 128, %s145_s2, [#allocation6]  }
  0x22   :  { %112 = dma.done.wait [#allocation6], 128  }
  0x23   :  { %113 = vsyncadd [#allocation6], 4294967168 }
  0x24   :  { %52 = vsyncpa [#allocation5], 1 }
  0x25   :  { %53 = vsyncpa [#allocation6], 1 }

</bundles_post_ra>
